<compile_context>
chip_gen: v7x
topology: tpu7x:2x2x1
jax: 0.10.0
libtpu: 0.0.40
codegen_flags: <defaults>
</compile_context>

<pallas_src>
import jax
import jax.numpy as jnp
from jax import lax
from jax.experimental import pallas as pl
from jax.experimental.pallas import tpu as pltpu

_R_CHUNK = 8  # sublane-sized reduction chunk


def _round_up(x, m):
    return (x + m - 1) // m * m


def _pick_tile(total, want, quantum):
    """Largest multiple of `quantum` that divides `total` and is <= max(want, quantum)."""
    want = max(quantum, (want // quantum) * quantum)
    best = quantum
    c = quantum
    lim = min(total, want)
    while c <= lim:
        if total % c == 0:
            best = c
        c += quantum
    return best


def _make_kernel(n_chunks, has_bias):
    def chunk(c, acc, x_ref, w_ref):
        if isinstance(c, int):
            off = c * _R_CHUNK                                   # static offset
        else:
            off = pl.multiple_of(c * _R_CHUNK, _R_CHUNK)         # aligned dynamic offset
        xc = x_ref[0, pl.ds(off, _R_CHUNK), :].astype(jnp.float32)   # (8, T_P)
        for j in range(_R_CHUNK):
            wr = w_ref[off + j].astype(jnp.float32)              # (T_OC, T_P) slab
            acc = acc + wr * xc[j:j + 1, :]                      # sublane-broadcast row j
        return acc

    def kernel(*refs):
        if has_bias:
            x_ref, w_ref, b_ref, o_ref = refs
        else:
            x_ref, w_ref, o_ref = refs
        _, t_oc, t_p = w_ref.shape
        acc = jnp.zeros((t_oc, t_p), jnp.float32)
        if n_chunks <= 32:
            # fully static unroll for the common (small R) case
            for c in range(n_chunks):
                acc = chunk(c, acc, x_ref, w_ref)
        else:
            acc = lax.fori_loop(0, n_chunks,
                                lambda c, a: chunk(c, a, x_ref, w_ref), acc)
        if has_bias:
            acc = acc + b_ref[...]
        o_ref[0] = acc.astype(o_ref.dtype)

    return kernel


def locally_connected_2d(x, weight, bias, kernel_size, stride,
                         *, block_oc=8, block_p=512, storage_dtype=None,
                         vmem_budget=24 * 1024 * 1024):
    """x: (N, C, H, W); weight: (1, OC, C, OH, OW, K*K); bias: (1, OC, OH, OW) or None."""
    kh, kw = kernel_size
    dh, dw = stride
    N, C, H, W = x.shape
    _, OC, _, OH, OW, K2 = weight.shape
    assert K2 == kh * kw
    assert OH == (H - kh) // dh + 1 and OW == (W - kw) // dw + 1
    out_dtype = x.dtype
    store_dt = storage_dtype if storage_dtype is not None else out_dtype

    # --- glue: torch .unfold(2,kh,dh).unfold(3,kw,dw) via static strided slices ---
    # TODO(synk): fuse the unfold into the kernel (strided loads from a (C,H,W)
    # VMEM block) so the K^2-times-larger x_unf is never materialized in HBM.
    cols = []
    for i in range(kh):
        for j in range(kw):
            cols.append(lax.slice(
                x, (0, 0, i, j),
                (N, C, i + (OH - 1) * dh + 1, j + (OW - 1) * dw + 1),
                (1, 1, dh, dw)))                                 # (N, C, OH, OW)
    patches = jnp.stack(cols, axis=2)                            # (N, C, K2, OH, OW)

    R = C * K2
    P = OH * OW
    R_pad = _round_up(R, _R_CHUNK)     # sublane multiple
    P_pad = _round_up(P, 128)          # lane-dense output (no masked vst)
    OC_pad = _round_up(OC, 8)

    has_bias = bias is not None
    itemsize = jnp.dtype(store_dt).itemsize
    out_itemsize = jnp.dtype(out_dtype).itemsize

    t_p = _pick_tile(P_pad, block_p, 128)
    t_oc = _pick_tile(OC_pad, block_oc, 8)

    def footprint(toc, tp):
        w_b = R_pad * toc * tp * itemsize
        x_b = R_pad * tp * itemsize
        o_b = toc * tp * out_itemsize
        b_b = toc * tp * 4 if has_bias else 0
        return 2 * (w_b + x_b + o_b + b_b)       # double-buffered pipeline

    while footprint(t_oc, t_p) > vmem_budget and (t_oc > 8 or t_p > 128):
        if t_oc > 8:
            t_oc = _pick_tile(OC_pad, t_oc // 2, 8)
        else:
            t_p = _pick_tile(P_pad, t_p // 2, 128)

    # x_unf: (N, R, P)   weight: (R, OC, P)  -> reduction axis is leading in-kernel.
    # TODO(synk): in a real model, hoist/cache this weight repack (recomputed per
    # call here because the op takes the raw module parameter layout).
    x_unf = patches.reshape(N, R, P)
    w_flat = jnp.transpose(weight[0], (1, 4, 0, 2, 3)).reshape(R, OC, P)
    x_unf = jnp.pad(x_unf, ((0, 0), (0, R_pad - R), (0, P_pad - P))).astype(store_dt)
    w_flat = jnp.pad(w_flat, ((0, R_pad - R), (0, OC_pad - OC), (0, P_pad - P))).astype(store_dt)

    in_specs = [
        pl.BlockSpec((1, R_pad, t_p), lambda oc, p, n: (n, 0, p)),      # per-batch patches
        pl.BlockSpec((R_pad, t_oc, t_p), lambda oc, p, n: (0, oc, p)),  # weight tile (resident over n)
    ]
    args = [x_unf, w_flat]
    if has_bias:
        b_flat = bias[0].reshape(OC, P).astype(jnp.float32)
        b_flat = jnp.pad(b_flat, ((0, OC_pad - OC), (0, P_pad - P)))
        in_specs.append(pl.BlockSpec((t_oc, t_p), lambda oc, p, n: (oc, p)))
        args.append(b_flat)

    grid = (OC_pad // t_oc, P_pad // t_p, N)

    out = pl.pallas_call(
        _make_kernel(R_pad // _R_CHUNK, has_bias),
        out_shape=jax.ShapeDtypeStruct((N, OC_pad, P_pad), out_dtype),
        grid_spec=pltpu.PrefetchScalarGridSpec(
            num_scalar_prefetch=0,
            grid=grid,
            in_specs=in_specs,
            out_specs=pl.BlockSpec((1, t_oc, t_p), lambda oc, p, n: (n, oc, p)),
        ),
        compiler_params=pltpu.CompilerParams(
            dimension_semantics=("parallel", "parallel", "parallel"),
            vmem_limit_bytes=32 * 1024 * 1024),
    )(*args)

    # slice the zero-padding back off and restore NCHW spatial layout
    return out[:, :OC, :P].reshape(N, OC, OH, OW)


def _reference(x, weight, bias, kernel_size, stride):
    """Pure-JAX mirror of the PyTorch forward for correctness checking."""
    kh, kw = kernel_size
    dh, dw = stride
    N, C, H, W = x.shape
    OH = (H - kh) // dh + 1
    OW = (W - kw) // dw + 1
    A = (jnp.arange(OH) * dh)[:, None, None, None] + jnp.arange(kh)[None, None, :, None]
    B = (jnp.arange(OW) * dw)[None, :, None, None] + jnp.arange(kw)[None, None, None, :]
    patches = x[:, :, A, B].reshape(N, C, OH, OW, kh * kw)
    out = jnp.sum(patches[:, None] * weight, axis=(2, -1))
    if bias is not None:
        out = out + bias
    return out


if __name__ == "__main__":
    key = jax.random.PRNGKey(0)
    # small shapes consistent with the module: batch=2, in_channels=4,
    # out_channels=8, spatial 16x16, kernel_size=3, stride=1 -> output 14x14
    N, C, H, W = 2, 4, 16, 16
    OC = 8
    ks, st = 3, 1
    OH = (H - ks) // st + 1
    OW = (W - ks) // st + 1

    kx, kwt, kb = jax.random.split(key, 3)
    x = jax.random.normal(kx, (N, C, H, W), dtype=jnp.float32)
    weight = jax.random.normal(kwt, (1, OC, C, OH, OW, ks * ks), dtype=jnp.float32)
    bias = jax.random.normal(kb, (1, OC, OH, OW), dtype=jnp.float32)

    # bias=False (module default), f32 storage
    out = locally_connected_2d(x, weight, None, (ks, ks), (st, st))
    jax.block_until_ready(out)
    assert out.shape == (N, OC, OH, OW)
    ref = _reference(x, weight, None, (ks, ks), (st, st))
    assert jnp.allclose(out, ref, atol=1e-4, rtol=1e-4), "mismatch (no bias)"

    # bias=True path
    out_b = locally_connected_2d(x, weight, bias, (ks, ks), (st, st))
    jax.block_until_ready(out_b)
    ref_b = _reference(x, weight, bias, (ks, ks), (st, st))
    assert jnp.allclose(out_b, ref_b, atol=1e-4, rtol=1e-4), "mismatch (bias)"

    # bf16-storage path (HBM-bound v5e/v6e optimization); f32 accumulation inside.
    out_bf = locally_connected_2d(x, weight, bias, (ks, ks), (st, st),
                                  storage_dtype=jnp.bfloat16)
    jax.block_until_ready(out_bf)
    assert out_bf.shape == (N, OC, OH, OW)
    assert bool(jnp.all(jnp.isfinite(out_bf)))
    assert float(jnp.max(jnp.abs(out_bf - ref_b))) < 0.5, "bf16 storage path way off"

    print("KERNEL_OK")
</pallas_src>

<mosaic_0001>
module attributes {stable_mosaic.version = 11 : i64} {
  func.func @kernel(%arg0: i32, %arg1: i32, %arg2: i32, %arg3: memref<1x40x256xf32, #tpu.memory_space<vmem>>, %arg4: memref<40x8x256xf32, #tpu.memory_space<vmem>>, %arg5: memref<1x8x256xf32, #tpu.memory_space<vmem>>) attributes {dimension_semantics = [#tpu.dimension_semantics<parallel>, #tpu.dimension_semantics<parallel>, #tpu.dimension_semantics<parallel>], iteration_bounds = array<i64: 1, 1, 2>, scalar_prefetch = 0 : i64, scratch_operands = 0 : i64, tpu.core_type = #tpu.core_type<tc>, window_params = [{transform_indices = @transform_0, window_bounds = array<i64: 1, 40, 256>}, {transform_indices = @transform_1, window_bounds = array<i64: 40, 8, 256>}, {transform_indices = @transform_2, window_bounds = array<i64: 1, 8, 256>}]} {
    %cst = arith.constant 0.000000e+00 : f32
    %0 = vector.broadcast %cst : f32 to vector<8x256xf32>
    %c0 = arith.constant 0 : index
    %c0_0 = arith.constant 0 : index
    %c0_1 = arith.constant 0 : index
    %1 = vector.load %arg3[%c0, %c0_0, %c0_1] : memref<1x40x256xf32, #tpu.memory_space<vmem>>, vector<1x8x256xf32>
    %2 = vector.shape_cast %1 : vector<1x8x256xf32> to vector<8x256xf32>
    %c0_2 = arith.constant 0 : index
    %c0_3 = arith.constant 0 : index
    %c0_4 = arith.constant 0 : index
    %3 = vector.load %arg4[%c0_2, %c0_3, %c0_4] : memref<40x8x256xf32, #tpu.memory_space<vmem>>, vector<1x8x256xf32>
    %4 = vector.shape_cast %3 : vector<1x8x256xf32> to vector<8x256xf32>
    %5 = vector.extract_strided_slice %2 {offsets = [0, 0], sizes = [1, 256], strides = [1, 1]} : vector<8x256xf32> to vector<1x256xf32>
    %6 = vector.broadcast %5 : vector<1x256xf32> to vector<8x256xf32>
    %7 = arith.mulf %4, %6 : vector<8x256xf32>
    %8 = arith.addf %0, %7 : vector<8x256xf32>
    %c1 = arith.constant 1 : index
    %c0_5 = arith.constant 0 : index
    %c0_6 = arith.constant 0 : index
    %9 = vector.load %arg4[%c1, %c0_5, %c0_6] : memref<40x8x256xf32, #tpu.memory_space<vmem>>, vector<1x8x256xf32>
    %10 = vector.shape_cast %9 : vector<1x8x256xf32> to vector<8x256xf32>
    %11 = vector.extract_strided_slice %2 {offsets = [1, 0], sizes = [1, 256], strides = [1, 1]} : vector<8x256xf32> to vector<1x256xf32>
    %12 = vector.broadcast %11 : vector<1x256xf32> to vector<8x256xf32>
    %13 = arith.mulf %10, %12 : vector<8x256xf32>
    %14 = arith.addf %8, %13 : vector<8x256xf32>
    %c2 = arith.constant 2 : index
    %c0_7 = arith.constant 0 : index
    %c0_8 = arith.constant 0 : index
    %15 = vector.load %arg4[%c2, %c0_7, %c0_8] : memref<40x8x256xf32, #tpu.memory_space<vmem>>, vector<1x8x256xf32>
    %16 = vector.shape_cast %15 : vector<1x8x256xf32> to vector<8x256xf32>
    %17 = vector.extract_strided_slice %2 {offsets = [2, 0], sizes = [1, 256], strides = [1, 1]} : vector<8x256xf32> to vector<1x256xf32>
    %18 = vector.broadcast %17 : vector<1x256xf32> to vector<8x256xf32>
    %19 = arith.mulf %16, %18 : vector<8x256xf32>
    %20 = arith.addf %14, %19 : vector<8x256xf32>
    %c3 = arith.constant 3 : index
    %c0_9 = arith.constant 0 : index
    %c0_10 = arith.constant 0 : index
    %21 = vector.load %arg4[%c3, %c0_9, %c0_10] : memref<40x8x256xf32, #tpu.memory_space<vmem>>, vector<1x8x256xf32>
    %22 = vector.shape_cast %21 : vector<1x8x256xf32> to vector<8x256xf32>
    %23 = vector.extract_strided_slice %2 {offsets = [3, 0], sizes = [1, 256], strides = [1, 1]} : vector<8x256xf32> to vector<1x256xf32>
    %24 = vector.broadcast %23 : vector<1x256xf32> to vector<8x256xf32>
    %25 = arith.mulf %22, %24 : vector<8x256xf32>
    %26 = arith.addf %20, %25 : vector<8x256xf32>
    %c4 = arith.constant 4 : index
    %c0_11 = arith.constant 0 : index
    %c0_12 = arith.constant 0 : index
    %27 = vector.load %arg4[%c4, %c0_11, %c0_12] : memref<40x8x256xf32, #tpu.memory_space<vmem>>, vector<1x8x256xf32>
    %28 = vector.shape_cast %27 : vector<1x8x256xf32> to vector<8x256xf32>
    %29 = vector.extract_strided_slice %2 {offsets = [4, 0], sizes = [1, 256], strides = [1, 1]} : vector<8x256xf32> to vector<1x256xf32>
    %30 = vector.broadcast %29 : vector<1x256xf32> to vector<8x256xf32>
    %31 = arith.mulf %28, %30 : vector<8x256xf32>
    %32 = arith.addf %26, %31 : vector<8x256xf32>
    %c5 = arith.constant 5 : index
    %c0_13 = arith.constant 0 : index
    %c0_14 = arith.constant 0 : index
    %33 = vector.load %arg4[%c5, %c0_13, %c0_14] : memref<40x8x256xf32, #tpu.memory_space<vmem>>, vector<1x8x256xf32>
    %34 = vector.shape_cast %33 : vector<1x8x256xf32> to vector<8x256xf32>
    %35 = vector.extract_strided_slice %2 {offsets = [5, 0], sizes = [1, 256], strides = [1, 1]} : vector<8x256xf32> to vector<1x256xf32>
    %36 = vector.broadcast %35 : vector<1x256xf32> to vector<8x256xf32>
    %37 = arith.mulf %34, %36 : vector<8x256xf32>
    %38 = arith.addf %32, %37 : vector<8x256xf32>
    %c6 = arith.constant 6 : index
    %c0_15 = arith.constant 0 : index
    %c0_16 = arith.constant 0 : index
    %39 = vector.load %arg4[%c6, %c0_15, %c0_16] : memref<40x8x256xf32, #tpu.memory_space<vmem>>, vector<1x8x256xf32>
    %40 = vector.shape_cast %39 : vector<1x8x256xf32> to vector<8x256xf32>
    %41 = vector.extract_strided_slice %2 {offsets = [6, 0], sizes = [1, 256], strides = [1, 1]} : vector<8x256xf32> to vector<1x256xf32>
    %42 = vector.broadcast %41 : vector<1x256xf32> to vector<8x256xf32>
    %43 = arith.mulf %40, %42 : vector<8x256xf32>
    %44 = arith.addf %38, %43 : vector<8x256xf32>
    %c7 = arith.constant 7 : index
    %c0_17 = arith.constant 0 : index
    %c0_18 = arith.constant 0 : index
    %45 = vector.load %arg4[%c7, %c0_17, %c0_18] : memref<40x8x256xf32, #tpu.memory_space<vmem>>, vector<1x8x256xf32>
    %46 = vector.shape_cast %45 : vector<1x8x256xf32> to vector<8x256xf32>
    %47 = vector.extract_strided_slice %2 {offsets = [7, 0], sizes = [1, 256], strides = [1, 1]} : vector<8x256xf32> to vector<1x256xf32>
    %48 = vector.broadcast %47 : vector<1x256xf32> to vector<8x256xf32>
    %49 = arith.mulf %46, %48 : vector<8x256xf32>
    %50 = arith.addf %44, %49 : vector<8x256xf32>
    %c0_19 = arith.constant 0 : index
    %c8 = arith.constant 8 : index
    %c0_20 = arith.constant 0 : index
    %51 = vector.load %arg3[%c0_19, %c8, %c0_20] : memref<1x40x256xf32, #tpu.memory_space<vmem>>, vector<1x8x256xf32>
    %52 = vector.shape_cast %51 : vector<1x8x256xf32> to vector<8x256xf32>
    %c8_21 = arith.constant 8 : index
    %c0_22 = arith.constant 0 : index
    %c0_23 = arith.constant 0 : index
    %53 = vector.load %arg4[%c8_21, %c0_22, %c0_23] : memref<40x8x256xf32, #tpu.memory_space<vmem>>, vector<1x8x256xf32>
    %54 = vector.shape_cast %53 : vector<1x8x256xf32> to vector<8x256xf32>
    %55 = vector.extract_strided_slice %52 {offsets = [0, 0], sizes = [1, 256], strides = [1, 1]} : vector<8x256xf32> to vector<1x256xf32>
    %56 = vector.broadcast %55 : vector<1x256xf32> to vector<8x256xf32>
    %57 = arith.mulf %54, %56 : vector<8x256xf32>
    %58 = arith.addf %50, %57 : vector<8x256xf32>
    %c9 = arith.constant 9 : index
    %c0_24 = arith.constant 0 : index
    %c0_25 = arith.constant 0 : index
    %59 = vector.load %arg4[%c9, %c0_24, %c0_25] : memref<40x8x256xf32, #tpu.memory_space<vmem>>, vector<1x8x256xf32>
    %60 = vector.shape_cast %59 : vector<1x8x256xf32> to vector<8x256xf32>
    %61 = vector.extract_strided_slice %52 {offsets = [1, 0], sizes = [1, 256], strides = [1, 1]} : vector<8x256xf32> to vector<1x256xf32>
    %62 = vector.broadcast %61 : vector<1x256xf32> to vector<8x256xf32>
    %63 = arith.mulf %60, %62 : vector<8x256xf32>
    %64 = arith.addf %58, %63 : vector<8x256xf32>
    %c10 = arith.constant 10 : index
    %c0_26 = arith.constant 0 : index
    %c0_27 = arith.constant 0 : index
    %65 = vector.load %arg4[%c10, %c0_26, %c0_27] : memref<40x8x256xf32, #tpu.memory_space<vmem>>, vector<1x8x256xf32>
    %66 = vector.shape_cast %65 : vector<1x8x256xf32> to vector<8x256xf32>
    %67 = vector.extract_strided_slice %52 {offsets = [2, 0], sizes = [1, 256], strides = [1, 1]} : vector<8x256xf32> to vector<1x256xf32>
    %68 = vector.broadcast %67 : vector<1x256xf32> to vector<8x256xf32>
    %69 = arith.mulf %66, %68 : vector<8x256xf32>
    %70 = arith.addf %64, %69 : vector<8x256xf32>
    %c11 = arith.constant 11 : index
    %c0_28 = arith.constant 0 : index
    %c0_29 = arith.constant 0 : index
    %71 = vector.load %arg4[%c11, %c0_28, %c0_29] : memref<40x8x256xf32, #tpu.memory_space<vmem>>, vector<1x8x256xf32>
    %72 = vector.shape_cast %71 : vector<1x8x256xf32> to vector<8x256xf32>
    %73 = vector.extract_strided_slice %52 {offsets = [3, 0], sizes = [1, 256], strides = [1, 1]} : vector<8x256xf32> to vector<1x256xf32>
    %74 = vector.broadcast %73 : vector<1x256xf32> to vector<8x256xf32>
    %75 = arith.mulf %72, %74 : vector<8x256xf32>
    %76 = arith.addf %70, %75 : vector<8x256xf32>
    %c12 = arith.constant 12 : index
    %c0_30 = arith.constant 0 : index
    %c0_31 = arith.constant 0 : index
    %77 = vector.load %arg4[%c12, %c0_30, %c0_31] : memref<40x8x256xf32, #tpu.memory_space<vmem>>, vector<1x8x256xf32>
    %78 = vector.shape_cast %77 : vector<1x8x256xf32> to vector<8x256xf32>
    %79 = vector.extract_strided_slice %52 {offsets = [4, 0], sizes = [1, 256], strides = [1, 1]} : vector<8x256xf32> to vector<1x256xf32>
    %80 = vector.broadcast %79 : vector<1x256xf32> to vector<8x256xf32>
    %81 = arith.mulf %78, %80 : vector<8x256xf32>
    %82 = arith.addf %76, %81 : vector<8x256xf32>
    %c13 = arith.constant 13 : index
    %c0_32 = arith.constant 0 : index
    %c0_33 = arith.constant 0 : index
    %83 = vector.load %arg4[%c13, %c0_32, %c0_33] : memref<40x8x256xf32, #tpu.memory_space<vmem>>, vector<1x8x256xf32>
    %84 = vector.shape_cast %83 : vector<1x8x256xf32> to vector<8x256xf32>
    %85 = vector.extract_strided_slice %52 {offsets = [5, 0], sizes = [1, 256], strides = [1, 1]} : vector<8x256xf32> to vector<1x256xf32>
    %86 = vector.broadcast %85 : vector<1x256xf32> to vector<8x256xf32>
    %87 = arith.mulf %84, %86 : vector<8x256xf32>
    %88 = arith.addf %82, %87 : vector<8x256xf32>
    %c14 = arith.constant 14 : index
    %c0_34 = arith.constant 0 : index
    %c0_35 = arith.constant 0 : index
    %89 = vector.load %arg4[%c14, %c0_34, %c0_35] : memref<40x8x256xf32, #tpu.memory_space<vmem>>, vector<1x8x256xf32>
    %90 = vector.shape_cast %89 : vector<1x8x256xf32> to vector<8x256xf32>
    %91 = vector.extract_strided_slice %52 {offsets = [6, 0], sizes = [1, 256], strides = [1, 1]} : vector<8x256xf32> to vector<1x256xf32>
    %92 = vector.broadcast %91 : vector<1x256xf32> to vector<8x256xf32>
    %93 = arith.mulf %90, %92 : vector<8x256xf32>
    %94 = arith.addf %88, %93 : vector<8x256xf32>
    %c15 = arith.constant 15 : index
    %c0_36 = arith.constant 0 : index
    %c0_37 = arith.constant 0 : index
    %95 = vector.load %arg4[%c15, %c0_36, %c0_37] : memref<40x8x256xf32, #tpu.memory_space<vmem>>, vector<1x8x256xf32>
    %96 = vector.shape_cast %95 : vector<1x8x256xf32> to vector<8x256xf32>
    %97 = vector.extract_strided_slice %52 {offsets = [7, 0], sizes = [1, 256], strides = [1, 1]} : vector<8x256xf32> to vector<1x256xf32>
    %98 = vector.broadcast %97 : vector<1x256xf32> to vector<8x256xf32>
    %99 = arith.mulf %96, %98 : vector<8x256xf32>
    %100 = arith.addf %94, %99 : vector<8x256xf32>
    %c0_38 = arith.constant 0 : index
    %c16 = arith.constant 16 : index
    %c0_39 = arith.constant 0 : index
    %101 = vector.load %arg3[%c0_38, %c16, %c0_39] : memref<1x40x256xf32, #tpu.memory_space<vmem>>, vector<1x8x256xf32>
    %102 = vector.shape_cast %101 : vector<1x8x256xf32> to vector<8x256xf32>
    %c16_40 = arith.constant 16 : index
    %c0_41 = arith.constant 0 : index
    %c0_42 = arith.constant 0 : index
    %103 = vector.load %arg4[%c16_40, %c0_41, %c0_42] : memref<40x8x256xf32, #tpu.memory_space<vmem>>, vector<1x8x256xf32>
    %104 = vector.shape_cast %103 : vector<1x8x256xf32> to vector<8x256xf32>
    %105 = vector.extract_strided_slice %102 {offsets = [0, 0], sizes = [1, 256], strides = [1, 1]} : vector<8x256xf32> to vector<1x256xf32>
    %106 = vector.broadcast %105 : vector<1x256xf32> to vector<8x256xf32>
    %107 = arith.mulf %104, %106 : vector<8x256xf32>
    %108 = arith.addf %100, %107 : vector<8x256xf32>
    %c17 = arith.constant 17 : index
    %c0_43 = arith.constant 0 : index
    %c0_44 = arith.constant 0 : index
    %109 = vector.load %arg4[%c17, %c0_43, %c0_44] : memref<40x8x256xf32, #tpu.memory_space<vmem>>, vector<1x8x256xf32>
    %110 = vector.shape_cast %109 : vector<1x8x256xf32> to vector<8x256xf32>
    %111 = vector.extract_strided_slice %102 {offsets = [1, 0], sizes = [1, 256], strides = [1, 1]} : vector<8x256xf32> to vector<1x256xf32>
    %112 = vector.broadcast %111 : vector<1x256xf32> to vector<8x256xf32>
    %113 = arith.mulf %110, %112 : vector<8x256xf32>
    %114 = arith.addf %108, %113 : vector<8x256xf32>
    %c18 = arith.constant 18 : index
    %c0_45 = arith.constant 0 : index
    %c0_46 = arith.constant 0 : index
    %115 = vector.load %arg4[%c18, %c0_45, %c0_46] : memref<40x8x256xf32, #tpu.memory_space<vmem>>, vector<1x8x256xf32>
    %116 = vector.shape_cast %115 : vector<1x8x256xf32> to vector<8x256xf32>
    %117 = vector.extract_strided_slice %102 {offsets = [2, 0], sizes = [1, 256], strides = [1, 1]} : vector<8x256xf32> to vector<1x256xf32>
    %118 = vector.broadcast %117 : vector<1x256xf32> to vector<8x256xf32>
    %119 = arith.mulf %116, %118 : vector<8x256xf32>
    %120 = arith.addf %114, %119 : vector<8x256xf32>
    %c19 = arith.constant 19 : index
    %c0_47 = arith.constant 0 : index
    %c0_48 = arith.constant 0 : index
    %121 = vector.load %arg4[%c19, %c0_47, %c0_48] : memref<40x8x256xf32, #tpu.memory_space<vmem>>, vector<1x8x256xf32>
    %122 = vector.shape_cast %121 : vector<1x8x256xf32> to vector<8x256xf32>
    %123 = vector.extract_strided_slice %102 {offsets = [3, 0], sizes = [1, 256], strides = [1, 1]} : vector<8x256xf32> to vector<1x256xf32>
    %124 = vector.broadcast %123 : vector<1x256xf32> to vector<8x256xf32>
    %125 = arith.mulf %122, %124 : vector<8x256xf32>
    %126 = arith.addf %120, %125 : vector<8x256xf32>
    %c20 = arith.constant 20 : index
    %c0_49 = arith.constant 0 : index
    %c0_50 = arith.constant 0 : index
    %127 = vector.load %arg4[%c20, %c0_49, %c0_50] : memref<40x8x256xf32, #tpu.memory_space<vmem>>, vector<1x8x256xf32>
    %128 = vector.shape_cast %127 : vector<1x8x256xf32> to vector<8x256xf32>
    %129 = vector.extract_strided_slice %102 {offsets = [4, 0], sizes = [1, 256], strides = [1, 1]} : vector<8x256xf32> to vector<1x256xf32>
    %130 = vector.broadcast %129 : vector<1x256xf32> to vector<8x256xf32>
    %131 = arith.mulf %128, %130 : vector<8x256xf32>
    %132 = arith.addf %126, %131 : vector<8x256xf32>
    %c21 = arith.constant 21 : index
    %c0_51 = arith.constant 0 : index
    %c0_52 = arith.constant 0 : index
    %133 = vector.load %arg4[%c21, %c0_51, %c0_52] : memref<40x8x256xf32, #tpu.memory_space<vmem>>, vector<1x8x256xf32>
    %134 = vector.shape_cast %133 : vector<1x8x256xf32> to vector<8x256xf32>
    %135 = vector.extract_strided_slice %102 {offsets = [5, 0], sizes = [1, 256], strides = [1, 1]} : vector<8x256xf32> to vector<1x256xf32>
    %136 = vector.broadcast %135 : vector<1x256xf32> to vector<8x256xf32>
    %137 = arith.mulf %134, %136 : vector<8x256xf32>
    %138 = arith.addf %132, %137 : vector<8x256xf32>
    %c22 = arith.constant 22 : index
    %c0_53 = arith.constant 0 : index
    %c0_54 = arith.constant 0 : index
    %139 = vector.load %arg4[%c22, %c0_53, %c0_54] : memref<40x8x256xf32, #tpu.memory_space<vmem>>, vector<1x8x256xf32>
    %140 = vector.shape_cast %139 : vector<1x8x256xf32> to vector<8x256xf32>
    %141 = vector.extract_strided_slice %102 {offsets = [6, 0], sizes = [1, 256], strides = [1, 1]} : vector<8x256xf32> to vector<1x256xf32>
    %142 = vector.broadcast %141 : vector<1x256xf32> to vector<8x256xf32>
    %143 = arith.mulf %140, %142 : vector<8x256xf32>
    %144 = arith.addf %138, %143 : vector<8x256xf32>
    %c23 = arith.constant 23 : index
    %c0_55 = arith.constant 0 : index
    %c0_56 = arith.constant 0 : index
    %145 = vector.load %arg4[%c23, %c0_55, %c0_56] : memref<40x8x256xf32, #tpu.memory_space<vmem>>, vector<1x8x256xf32>
    %146 = vector.shape_cast %145 : vector<1x8x256xf32> to vector<8x256xf32>
    %147 = vector.extract_strided_slice %102 {offsets = [7, 0], sizes = [1, 256], strides = [1, 1]} : vector<8x256xf32> to vector<1x256xf32>
    %148 = vector.broadcast %147 : vector<1x256xf32> to vector<8x256xf32>
    %149 = arith.mulf %146, %148 : vector<8x256xf32>
    %150 = arith.addf %144, %149 : vector<8x256xf32>
    %c0_57 = arith.constant 0 : index
    %c24 = arith.constant 24 : index
    %c0_58 = arith.constant 0 : index
    %151 = vector.load %arg3[%c0_57, %c24, %c0_58] : memref<1x40x256xf32, #tpu.memory_space<vmem>>, vector<1x8x256xf32>
    %152 = vector.shape_cast %151 : vector<1x8x256xf32> to vector<8x256xf32>
    %c24_59 = arith.constant 24 : index
    %c0_60 = arith.constant 0 : index
    %c0_61 = arith.constant 0 : index
    %153 = vector.load %arg4[%c24_59, %c0_60, %c0_61] : memref<40x8x256xf32, #tpu.memory_space<vmem>>, vector<1x8x256xf32>
    %154 = vector.shape_cast %153 : vector<1x8x256xf32> to vector<8x256xf32>
    %155 = vector.extract_strided_slice %152 {offsets = [0, 0], sizes = [1, 256], strides = [1, 1]} : vector<8x256xf32> to vector<1x256xf32>
    %156 = vector.broadcast %155 : vector<1x256xf32> to vector<8x256xf32>
    %157 = arith.mulf %154, %156 : vector<8x256xf32>
    %158 = arith.addf %150, %157 : vector<8x256xf32>
    %c25 = arith.constant 25 : index
    %c0_62 = arith.constant 0 : index
    %c0_63 = arith.constant 0 : index
    %159 = vector.load %arg4[%c25, %c0_62, %c0_63] : memref<40x8x256xf32, #tpu.memory_space<vmem>>, vector<1x8x256xf32>
    %160 = vector.shape_cast %159 : vector<1x8x256xf32> to vector<8x256xf32>
    %161 = vector.extract_strided_slice %152 {offsets = [1, 0], sizes = [1, 256], strides = [1, 1]} : vector<8x256xf32> to vector<1x256xf32>
    %162 = vector.broadcast %161 : vector<1x256xf32> to vector<8x256xf32>
    %163 = arith.mulf %160, %162 : vector<8x256xf32>
    %164 = arith.addf %158, %163 : vector<8x256xf32>
    %c26 = arith.constant 26 : index
    %c0_64 = arith.constant 0 : index
    %c0_65 = arith.constant 0 : index
    %165 = vector.load %arg4[%c26, %c0_64, %c0_65] : memref<40x8x256xf32, #tpu.memory_space<vmem>>, vector<1x8x256xf32>
    %166 = vector.shape_cast %165 : vector<1x8x256xf32> to vector<8x256xf32>
    %167 = vector.extract_strided_slice %152 {offsets = [2, 0], sizes = [1, 256], strides = [1, 1]} : vector<8x256xf32> to vector<1x256xf32>
    %168 = vector.broadcast %167 : vector<1x256xf32> to vector<8x256xf32>
    %169 = arith.mulf %166, %168 : vector<8x256xf32>
    %170 = arith.addf %164, %169 : vector<8x256xf32>
    %c27 = arith.constant 27 : index
    %c0_66 = arith.constant 0 : index
    %c0_67 = arith.constant 0 : index
    %171 = vector.load %arg4[%c27, %c0_66, %c0_67] : memref<40x8x256xf32, #tpu.memory_space<vmem>>, vector<1x8x256xf32>
    %172 = vector.shape_cast %171 : vector<1x8x256xf32> to vector<8x256xf32>
    %173 = vector.extract_strided_slice %152 {offsets = [3, 0], sizes = [1, 256], strides = [1, 1]} : vector<8x256xf32> to vector<1x256xf32>
    %174 = vector.broadcast %173 : vector<1x256xf32> to vector<8x256xf32>
    %175 = arith.mulf %172, %174 : vector<8x256xf32>
    %176 = arith.addf %170, %175 : vector<8x256xf32>
    %c28 = arith.constant 28 : index
    %c0_68 = arith.constant 0 : index
    %c0_69 = arith.constant 0 : index
    %177 = vector.load %arg4[%c28, %c0_68, %c0_69] : memref<40x8x256xf32, #tpu.memory_space<vmem>>, vector<1x8x256xf32>
    %178 = vector.shape_cast %177 : vector<1x8x256xf32> to vector<8x256xf32>
    %179 = vector.extract_strided_slice %152 {offsets = [4, 0], sizes = [1, 256], strides = [1, 1]} : vector<8x256xf32> to vector<1x256xf32>
    %180 = vector.broadcast %179 : vector<1x256xf32> to vector<8x256xf32>
    %181 = arith.mulf %178, %180 : vector<8x256xf32>
    %182 = arith.addf %176, %181 : vector<8x256xf32>
    %c29 = arith.constant 29 : index
    %c0_70 = arith.constant 0 : index
    %c0_71 = arith.constant 0 : index
    %183 = vector.load %arg4[%c29, %c0_70, %c0_71] : memref<40x8x256xf32, #tpu.memory_space<vmem>>, vector<1x8x256xf32>
    %184 = vector.shape_cast %183 : vector<1x8x256xf32> to vector<8x256xf32>
    %185 = vector.extract_strided_slice %152 {offsets = [5, 0], sizes = [1, 256], strides = [1, 1]} : vector<8x256xf32> to vector<1x256xf32>
    %186 = vector.broadcast %185 : vector<1x256xf32> to vector<8x256xf32>
    %187 = arith.mulf %184, %186 : vector<8x256xf32>
    %188 = arith.addf %182, %187 : vector<8x256xf32>
    %c30 = arith.constant 30 : index
    %c0_72 = arith.constant 0 : index
    %c0_73 = arith.constant 0 : index
    %189 = vector.load %arg4[%c30, %c0_72, %c0_73] : memref<40x8x256xf32, #tpu.memory_space<vmem>>, vector<1x8x256xf32>
    %190 = vector.shape_cast %189 : vector<1x8x256xf32> to vector<8x256xf32>
    %191 = vector.extract_strided_slice %152 {offsets = [6, 0], sizes = [1, 256], strides = [1, 1]} : vector<8x256xf32> to vector<1x256xf32>
    %192 = vector.broadcast %191 : vector<1x256xf32> to vector<8x256xf32>
    %193 = arith.mulf %190, %192 : vector<8x256xf32>
    %194 = arith.addf %188, %193 : vector<8x256xf32>
    %c31 = arith.constant 31 : index
    %c0_74 = arith.constant 0 : index
    %c0_75 = arith.constant 0 : index
    %195 = vector.load %arg4[%c31, %c0_74, %c0_75] : memref<40x8x256xf32, #tpu.memory_space<vmem>>, vector<1x8x256xf32>
    %196 = vector.shape_cast %195 : vector<1x8x256xf32> to vector<8x256xf32>
    %197 = vector.extract_strided_slice %152 {offsets = [7, 0], sizes = [1, 256], strides = [1, 1]} : vector<8x256xf32> to vector<1x256xf32>
    %198 = vector.broadcast %197 : vector<1x256xf32> to vector<8x256xf32>
    %199 = arith.mulf %196, %198 : vector<8x256xf32>
    %200 = arith.addf %194, %199 : vector<8x256xf32>
    %c0_76 = arith.constant 0 : index
    %c32 = arith.constant 32 : index
    %c0_77 = arith.constant 0 : index
    %201 = vector.load %arg3[%c0_76, %c32, %c0_77] : memref<1x40x256xf32, #tpu.memory_space<vmem>>, vector<1x8x256xf32>
    %202 = vector.shape_cast %201 : vector<1x8x256xf32> to vector<8x256xf32>
    %c32_78 = arith.constant 32 : index
    %c0_79 = arith.constant 0 : index
    %c0_80 = arith.constant 0 : index
    %203 = vector.load %arg4[%c32_78, %c0_79, %c0_80] : memref<40x8x256xf32, #tpu.memory_space<vmem>>, vector<1x8x256xf32>
    %204 = vector.shape_cast %203 : vector<1x8x256xf32> to vector<8x256xf32>
    %205 = vector.extract_strided_slice %202 {offsets = [0, 0], sizes = [1, 256], strides = [1, 1]} : vector<8x256xf32> to vector<1x256xf32>
    %206 = vector.broadcast %205 : vector<1x256xf32> to vector<8x256xf32>
    %207 = arith.mulf %204, %206 : vector<8x256xf32>
    %208 = arith.addf %200, %207 : vector<8x256xf32>
    %c33 = arith.constant 33 : index
    %c0_81 = arith.constant 0 : index
    %c0_82 = arith.constant 0 : index
    %209 = vector.load %arg4[%c33, %c0_81, %c0_82] : memref<40x8x256xf32, #tpu.memory_space<vmem>>, vector<1x8x256xf32>
    %210 = vector.shape_cast %209 : vector<1x8x256xf32> to vector<8x256xf32>
    %211 = vector.extract_strided_slice %202 {offsets = [1, 0], sizes = [1, 256], strides = [1, 1]} : vector<8x256xf32> to vector<1x256xf32>
    %212 = vector.broadcast %211 : vector<1x256xf32> to vector<8x256xf32>
    %213 = arith.mulf %210, %212 : vector<8x256xf32>
    %214 = arith.addf %208, %213 : vector<8x256xf32>
    %c34 = arith.constant 34 : index
    %c0_83 = arith.constant 0 : index
    %c0_84 = arith.constant 0 : index
    %215 = vector.load %arg4[%c34, %c0_83, %c0_84] : memref<40x8x256xf32, #tpu.memory_space<vmem>>, vector<1x8x256xf32>
    %216 = vector.shape_cast %215 : vector<1x8x256xf32> to vector<8x256xf32>
    %217 = vector.extract_strided_slice %202 {offsets = [2, 0], sizes = [1, 256], strides = [1, 1]} : vector<8x256xf32> to vector<1x256xf32>
    %218 = vector.broadcast %217 : vector<1x256xf32> to vector<8x256xf32>
    %219 = arith.mulf %216, %218 : vector<8x256xf32>
    %220 = arith.addf %214, %219 : vector<8x256xf32>
    %c35 = arith.constant 35 : index
    %c0_85 = arith.constant 0 : index
    %c0_86 = arith.constant 0 : index
    %221 = vector.load %arg4[%c35, %c0_85, %c0_86] : memref<40x8x256xf32, #tpu.memory_space<vmem>>, vector<1x8x256xf32>
    %222 = vector.shape_cast %221 : vector<1x8x256xf32> to vector<8x256xf32>
    %223 = vector.extract_strided_slice %202 {offsets = [3, 0], sizes = [1, 256], strides = [1, 1]} : vector<8x256xf32> to vector<1x256xf32>
    %224 = vector.broadcast %223 : vector<1x256xf32> to vector<8x256xf32>
    %225 = arith.mulf %222, %224 : vector<8x256xf32>
    %226 = arith.addf %220, %225 : vector<8x256xf32>
    %c36 = arith.constant 36 : index
    %c0_87 = arith.constant 0 : index
    %c0_88 = arith.constant 0 : index
    %227 = vector.load %arg4[%c36, %c0_87, %c0_88] : memref<40x8x256xf32, #tpu.memory_space<vmem>>, vector<1x8x256xf32>
    %228 = vector.shape_cast %227 : vector<1x8x256xf32> to vector<8x256xf32>
    %229 = vector.extract_strided_slice %202 {offsets = [4, 0], sizes = [1, 256], strides = [1, 1]} : vector<8x256xf32> to vector<1x256xf32>
    %230 = vector.broadcast %229 : vector<1x256xf32> to vector<8x256xf32>
    %231 = arith.mulf %228, %230 : vector<8x256xf32>
    %232 = arith.addf %226, %231 : vector<8x256xf32>
    %c37 = arith.constant 37 : index
    %c0_89 = arith.constant 0 : index
    %c0_90 = arith.constant 0 : index
    %233 = vector.load %arg4[%c37, %c0_89, %c0_90] : memref<40x8x256xf32, #tpu.memory_space<vmem>>, vector<1x8x256xf32>
    %234 = vector.shape_cast %233 : vector<1x8x256xf32> to vector<8x256xf32>
    %235 = vector.extract_strided_slice %202 {offsets = [5, 0], sizes = [1, 256], strides = [1, 1]} : vector<8x256xf32> to vector<1x256xf32>
    %236 = vector.broadcast %235 : vector<1x256xf32> to vector<8x256xf32>
    %237 = arith.mulf %234, %236 : vector<8x256xf32>
    %238 = arith.addf %232, %237 : vector<8x256xf32>
    %c38 = arith.constant 38 : index
    %c0_91 = arith.constant 0 : index
    %c0_92 = arith.constant 0 : index
    %239 = vector.load %arg4[%c38, %c0_91, %c0_92] : memref<40x8x256xf32, #tpu.memory_space<vmem>>, vector<1x8x256xf32>
    %240 = vector.shape_cast %239 : vector<1x8x256xf32> to vector<8x256xf32>
    %241 = vector.extract_strided_slice %202 {offsets = [6, 0], sizes = [1, 256], strides = [1, 1]} : vector<8x256xf32> to vector<1x256xf32>
    %242 = vector.broadcast %241 : vector<1x256xf32> to vector<8x256xf32>
    %243 = arith.mulf %240, %242 : vector<8x256xf32>
    %244 = arith.addf %238, %243 : vector<8x256xf32>
    %c39 = arith.constant 39 : index
    %c0_93 = arith.constant 0 : index
    %c0_94 = arith.constant 0 : index
    %245 = vector.load %arg4[%c39, %c0_93, %c0_94] : memref<40x8x256xf32, #tpu.memory_space<vmem>>, vector<1x8x256xf32>
    %246 = vector.shape_cast %245 : vector<1x8x256xf32> to vector<8x256xf32>
    %247 = vector.extract_strided_slice %202 {offsets = [7, 0], sizes = [1, 256], strides = [1, 1]} : vector<8x256xf32> to vector<1x256xf32>
    %248 = vector.broadcast %247 : vector<1x256xf32> to vector<8x256xf32>
    %249 = arith.mulf %246, %248 : vector<8x256xf32>
    %250 = arith.addf %244, %249 : vector<8x256xf32>
    %c0_95 = arith.constant 0 : index
    %c0_96 = arith.constant 0 : index
    %c0_97 = arith.constant 0 : index
    %251 = vector.load %arg5[%c0_95, %c0_96, %c0_97] : memref<1x8x256xf32, #tpu.memory_space<vmem>>, vector<1x8x256xf32>
    %252 = vector.shape_cast %251 : vector<1x8x256xf32> to vector<8x256xf32>
    %253 = vector.shape_cast %250 : vector<8x256xf32> to vector<1x8x256xf32>
    tpu.vector_store %arg5[%c0_95, %c0_96, %c0_97], %253 {strides = array<i32>} : memref<1x8x256xf32, #tpu.memory_space<vmem>>, vector<1x8x256xf32>,
    return
  }
  func.func @transform_0(%arg0: i32, %arg1: i32, %arg2: i32) -> (i32, i32, i32) {
    %c0_i32 = arith.constant 0 : i32
    %c0_i32_0 = arith.constant 0 : i32
    return %arg2, %c0_i32, %arg1 : i32, i32, i32
  }
  func.func @transform_1(%arg0: i32, %arg1: i32, %arg2: i32) -> (i32, i32, i32) {
    %c0_i32 = arith.constant 0 : i32
    %c0_i32_0 = arith.constant 0 : i32
    return %c0_i32, %arg0, %arg1 : i32, i32, i32
  }
  func.func @transform_2(%arg0: i32, %arg1: i32, %arg2: i32) -> (i32, i32, i32) {
    %c0_i32 = arith.constant 0 : i32
    return %arg2, %arg0, %arg1 : i32, i32, i32
  }
}

</mosaic_0001>

<bundles_post_ra>
// kernel: tpu_custom_call.1
= control target key start
LH: loop header
LB: loop body
LE: loop exit
PB: predicated region body
PF: predicated region fallthrough
CT: control target
= control target key end

     0   :  { %7 = vsyncpa [#allocation3], 0  ;;  %s1638_s0 = inlined_call_operand.hbm [shape: f32[2,40,256], index: 0, kind: input, shape index: {}]   ;;  %s1639_s1 = inlined_call_operand.hbm [shape: f32[40,8,256], index: 1, kind: input, shape index: {}]   ;;  %s1640_s2 = inlined_call_operand.hbm [shape: f32[2,8,256], index: 2, kind: output, shape index: {}]  }
   0x1   :  { %9 = vsyncpa [#allocation3 + $0x1], 0 }
   0x2   :  { %10 = vsyncpa [#allocation6], 0 }
   0x3   :  { %11 = vsyncpa [#allocation4], 0 }
   0x4   :  { %13 = vsyncpa [#allocation4 + $0x1], 0  ;;  %s1212_s9 = smov 0   ;;  %s1214_s10 = smov 0  }
   0x5   :  { %s1216_s11 = smov 0   ;;  %s1218_s12 = smov 0  }
   0x6   :  { %s1220_s13 = smov 0   ;;  %s1222_s14 = smov 0  }
   0x7 LB: > { %s953_s15 = sadd.s32 4294967295, %s1190_s14   ;;  %s954_s16 = sadd.s32 4294967294, %s1190_s14   ;;  %s1190_s14 = sphi %s1222_s14, %s19_s14   ;;  %s1186_s13 = sphi %s1220_s13, %s1663_s13   ;;  %s1182_s12 = sphi %s1218_s12, %s1662_s12   ;;  %s1178_s11 = sphi %s1216_s11, %s1661_s11   ;;  %s1174_s10 = sphi %s1214_s10, %s1660_s10   ;;  %s1170_s9 = sphi %s1212_s9, %s1659_s9  }
   0x8   : > { %p60_p0 = scmp.ne.s32.totalorder %s1174_s10, %s1170_s9  ;;  %p1246_p1 = scmp.eq.s32.totalorder %s953_s15, 0 }
   0x9   : > { %p1250_p2 = scmp.eq.s32.totalorder %s953_s15, 1  ;;  %p122_p3 = scmp.eq.s32.totalorder %s954_s16, 1 }
   0xa   : > { %s1645_s17 = scalar_select %p1246_p1, 1, 0 }
   0xb   : > { %s1646_s18 = scalar_select %p1250_p2, 1, 0 }
   0xc   : > { %p1256_p4 = por %p1246_p1, %p60_p0  ;;  %p955_p5 = scmp.ge.s32.totalorder %s1190_s14, 1 }
   0xd   : > { %p1261_p6 = por %p122_p3, %p60_p0  ;;  %p129_p7 = scmp.lt.s32.totalorder %s1190_s14, 3 }
   0xe   : > { %s1647_s19 = scalar_select %p1256_p4, 1, 0 }
   0xf   : > { %s1648_s20 = scalar_select %p1261_p6, 1, 0 }
  0x10   : > { %p1266_p8 = pnand %p955_p5, %p129_p7  ;;  %s1192_s22 = smov [#allocation5]  }
  0x11   : > { %s146_s23 = sshll.u32 %s1192_s22, 4  ;;  %s31_s25 = sadd.s32 1, %s1186_s13  ;;  %s147_s23 = int_to_ptr.vmem [resolvable:$true] %s146_s23 }
  0x12   : > { %s1649_s21 = scalar_select %p1266_p8, 1, 0 }
  0x13   : > { %p979_p9 = pneg %p1266_p8  ;;  %s1046_s28 = scalar_lea.hbm %s1639_s1, 10240 }
  0x14   : > { %p1047_p12 = scmp.ne.s32.totalorder %s1639_s1, %s1046_s28  ;;  %p1053_p5 = scmp.lt.u32.totalorder %s1046_s28, %s1639_s1 }
  0x15   : > { %p1275_p11 = pnand %p979_p9, %p1246_p1 }
  0x17   : > { %p1048_p13 = pneg %p1275_p11 }
  0x19   : > { %p1049_p0 = pnand %p1048_p13, %p1047_p12 }
  0x1b   : > { %p1050_p3 = pneg %p1049_p0 }
  0x1d   : > { %p1055_p7 = pnand %p1053_p5, %p1050_p3 }
  0x1f   : > { %1058 = shalt.err (!%p1055_p7)
}
  0x20   : > { %s1059_s5 = scalar_lea.vmem %s147_s23, 10240  ;;  %p1067_p1 = scmp.lt.s32.totalorder %s147_s23, %s147_s23 }
  0x21   : > { %p1060_p9 = scmp.ne.s32.totalorder %s147_s23, %s1059_s5  ;;  %p1068_p4 = scmp.lt.s32.totalorder %s1059_s5, %s1059_s5 }
  0x23   : > { %p1062_p10 = pnand %p1060_p9, %p1048_p13  ;;  %p1069_p8 = por %p1068_p4, %p1067_p1 }
  0x25   : > { %p1063_p6 = pneg %p1062_p10 }
  0x27   : > { %p1070_p2 = pnand %p1069_p8, %p1063_p6 }
  0x29   : > { %1073 = shalt.err (!%p1070_p2)
}
  0x2a   : > { %s1193_s6 = smov 256   ;;  %s1194_s7 = smov 16  }
  0x2b   : > { %982 = dma.hbm_to_vmem [thread:$0]  (!%p1275_p11), %s1639_s1, 10240, %s147_s23, [#allocation6], %s1193_s6, %s1193_s6, %s1194_s7  }
  0x2c   : > { %p32_p1 = scmp.ge.s32.totalorder %s31_s25, 2  ;;  %s47_s16 = sadd.s32 1, %s1178_s11 }
  0x2d   : > { %p54_p2 = scmp.ne.s32.totalorder %s1178_s11, %s1174_s10  ;;  %p55_p4 = scmp.eq.s32.totalorder %s1190_s14, 0 }
  0x2e   : > { %s1665_s25 = smov (%p32_p1, %s31_s25), 0  ;;  %p1651_p8 = scmp.ne.s32.totalorder %s1646_s18, 0 }
  0x2f   : > { %p56_p6 = por %p55_p4, %p54_p2  ;;  %s42_s24 = ssub.s32 %s1186_s13, %s1665_s25 }
  0x30   : > { %p1307_p10 = por %p1651_p8, %p54_p2  ;;  %p992_p12 = scmp.lt.s32.totalorder %s1190_s14, 2 }
  0x31   : > { %p45_p13 = scmp.eq.s32.totalorder %s42_s24, 0  ;;  %s160_s26 = sand.u32 1, %s1178_s11  }
  0x32   : > { %s968_s27 = smul.u32 80, %s160_s26  ;;  %p1319_p11 = pnand %p992_p12, %p56_p6 }
  0x33   : > { %s1316_s28 = scalar_select %p45_p13, %s1178_s11, %s47_s16  }
  0x34   : > { %s969_s23 = smul.u32 1280, %s1186_s13  ;;  %s164_s29 = scalar_lea.vmem [#allocation2], %s968_s27 }
  0x35   : > { %s173_s30 = sshll.u32 %s164_s29, 4  ;;  %s1330_s8 = scalar_lea.sflag [#allocation3], %s160_s26  ;;  %s1328_s30 = int_to_ptr.vmem [resolvable:$true] %s173_s30 }
  0x36   : > { %s1326_s5 = scalar_lea.hbm %s1638_s0, %s969_s23  ;;  %p1076_p3 = pneg %p1319_p11 }
  0x37   : > { %s1074_s15 = scalar_lea.hbm %s1326_s5, 1280  ;;  %s1079_s27 = scalar_lea.hbm %s1638_s0, 2560 }
  0x38   : > { %p1075_p0 = scmp.ne.s32.totalorder %s1326_s5, %s1074_s15  ;;  %p1080_p9 = scmp.lt.u32.totalorder %s1326_s5, %s1638_s0 }
  0x39   : > { %p1081_p1 = scmp.lt.u32.totalorder %s1079_s27, %s1074_s15  ;;  %p1083_p4 = scmp.lt.u32.totalorder %s1074_s15, %s1326_s5 }
  0x3a   : > { %p1077_p5 = pnand %p1076_p3, %p1075_p0 }
  0x3b   : > { %p1082_p2 = por %p1081_p1, %p1080_p9 }
  0x3c   : > { %p1078_p7 = pneg %p1077_p5 }
  0x3d   : > { %p1084_p6 = por %p1083_p4, %p1082_p2 }
  0x3f   : > { %p1085_p8 = pnand %p1084_p6, %p1078_p7 }
  0x41   : > { %1088 = shalt.err (!%p1085_p8)
}
  0x42   : > { %s1089_s26 = scalar_lea.vmem %s1328_s30, 1280  ;;  %s1195_s4 = smov [#allocation2]  }
  0x43   : > { %p1090_p12 = scmp.ne.s32.totalorder %s1328_s30, %s1089_s26  ;;  %s1094_s18 = sshll.u32 %s1195_s4, 4  ;;  %s1095_s18 = int_to_ptr.vmem [resolvable:$false] %s1094_s18 }
  0x44   : > { %s1096_s16 = scalar_lea.vmem %s1095_s18, 2560  ;;  %p1097_p5 = scmp.lt.s32.totalorder %s1328_s30, %s1095_s18 }
  0x45   : > { %p1092_p13 = pnand %p1090_p12, %p1076_p3  ;;  %p1098_p9 = scmp.lt.s32.totalorder %s1096_s16, %s1089_s26 }
  0x47   : > { %p1093_p0 = pneg %p1092_p13  ;;  %p1099_p1 = por %p1098_p9, %p1097_p5 }
  0x49   : > { %p1100_p2 = pnand %p1099_p1, %p1093_p0 }
  0x4b   : > { %1103 = shalt.err (!%p1100_p2)
}
  0x4c   : > { %986 = dma.hbm_to_vmem [thread:$0]  (!%p1319_p11), %s1326_s5, 1280, %s1328_s30, %s1330_s8, %s1193_s6, %s1193_s6, %s1194_s7  }
  0x4d   : > { %p1654_p3 = scmp.ne.s32.totalorder %s1649_s21, 0 }
  0x4e   : > { %s1364_s15 = sand.u32 (!%p1654_p3), 1, %s1174_s10   ;;  %p1655_p7 = scmp.ne.s32.totalorder (!%p1654_p3), %s1647_s19, 0 }
  0x4f   : > { %185 = sbr.rel (%p1654_p3) target bundleno = 192 (0xc0), region = 28  ;;  %s188_s27 = scalar_lea.sflag (!%p1654_p3), [#allocation3], %s1364_s15 }
  0x50   : > { %s970_s24 = smul.u32 (!%p1654_p3), 80, %s1364_s15 }
  0x52   : > { %s1368_s23 = scalar_lea.vmem (!%p1654_p3), [#allocation2], %s970_s24 }
  0x56   : > { %1157 = dma.done.wait (%p1655_p7), %s188_s27, 1280  }
  0x57   : > { %1159 = vsyncadd (%p1655_p7), %s188_s27, 4294966016  ;;  %p1656_p11 = scmp.ne.s32.totalorder %s1645_s17, 0 }
  0x59   : > { %1161 = dma.done.wait (%p1656_p11), [#allocation6], 10240  }
  0x5a   : > { %1163 = vsyncadd (%p1656_p11), [#allocation6], 4294957056  ;;  %v223_v0 = vlaneseq  ;;  %v1389_v7 = vld [vmem:[%s1368_s23] sm:$0xff]  ;;  %v1392_v8 = vld [vmem:[%s1368_s23 + $0x8] sm:$0xff]  ;;  %s961_s17 = sshll.u32 %s1364_s15, 4  ;;  %s967_s19 = sshll.u32 %s1182_s12, 8 }
  0x5b   : > { %v221_v9 = vld [vmem:[#allocation5] sm:$0xff]  ;;  %v222_v13 = vld [vmem:[#allocation5 + $0x8] sm:$0xff]  ;;  %v236_v16 = vld [vmem:[#allocation5 + $0x10] sm:$0xff]  ;;  %s215_s21 = scalar_lea.vmem [#allocation7], %s961_s17  ;;  %s1589_s3 = scalar_lea.hbm %s1640_s2, %s967_s19 }
  0x5c   : > { %v224_v1 = vshrl.u32 %v223_v0, 7  ;;  %v237_v17 = vld [vmem:[#allocation5 + $0x18] sm:$0xff]  ;;  %v251_v20 = vld [vmem:[#allocation5 + $0x20] sm:$0xff]  ;;  %v252_v21 = vld [vmem:[#allocation5 + $0x28] sm:$0xff]  ;;  %s849_s6 = sshll.u32 %s215_s21, 4  ;;  %s831_s5 = scalar_lea.sflag [#allocation4], %s1364_s15  ;;  %s1591_s6 = int_to_ptr.vmem [resolvable:$true] %s849_s6 }
  0x5d   : > { %v266_v24 = vld [vmem:[#allocation5 + $0x30] sm:$0xff]  ;;  %v267_v31 = vld [vmem:[#allocation5 + $0x38] sm:$0xff]  ;;  %v281_v36 = vld [vmem:[#allocation5 + $0x40] sm:$0xff]  ;;  %s1104_s12 = scalar_lea.vmem %s1591_s6, 256  ;;  %s1196_s8 = smov [#allocation7]  }
  0x5e   : > { %v1378_v2 = vsub.s32 0, %v224_v1  ;;  %v1380_v3 = vsub.s32 1, %v224_v1  ;;  %v1382_v4 = vsub.s32 2, %v224_v1  ;;  %v1384_v5 = vsub.s32 3, %v224_v1  ;;  %v282_v37 = vld [vmem:[#allocation5 + $0x48] sm:$0xff]  ;;  %v296_v42 = vld [vmem:[#allocation5 + $0x50] sm:$0xff]  ;;  %p1105_p4 = scmp.ne.s32.totalorder %s1591_s6, %s1104_s12 }
  0x5f   : > { %v1386_v6 = vsub.s32 4, %v224_v1  ;;  %v1394_v10 = vsub.s32 5, %v224_v1  ;;  %v1396_v11 = vsub.s32 6, %v224_v1  ;;  %v1398_v12 = vsub.s32 7, %v224_v1  ;;  %v297_v43 = vld [vmem:[#allocation5 + $0x58] sm:$0xff]  ;;  %v1429_v52 = vld [vmem:[%s1368_s23 + $0x10] sm:$0xff] }
  0x60   : > { %v226_v14 = vrot.slane %v1389_v7, %v1378_v2  ;;  %v230_v15 = vrot.slane %v1392_v8, %v1378_v2  ;;  %v241_v18 = vrot.slane %v1389_v7, %v1380_v3  ;;  %v245_v19 = vrot.slane %v1392_v8, %v1380_v3  ;;  %v1432_v53 = vld [vmem:[%s1368_s23 + $0x18] sm:$0xff]  ;;  %v311_v56 = vld [vmem:[#allocation5 + $0x60] sm:$0xff]  ;;  %v326_v62 = vld [vmem:[#allocation5 + $0x70] sm:$0xff]  ;;  %p1106_p6 = pnand %p1105_p4, %p1307_p10  ;;  %s1108_s29 = sshll.u32 %s1196_s8, 4  ;;  %s1109_s29 = int_to_ptr.vmem [resolvable:$false] %s1108_s29 }
  0x61   : > { %v256_v22 = vrot.slane %v1389_v7, %v1382_v4  ;;  %v260_v23 = vrot.slane %v1392_v8, %v1382_v4  ;;  %v271_v25 = vrot.slane %v1389_v7, %v1384_v5  ;;  %v275_v26 = vrot.slane %v1392_v8, %v1384_v5  ;;  %v312_v57 = vld [vmem:[#allocation5 + $0x68] sm:$0xff]  ;;  %v327_v63 = vld [vmem:[#allocation5 + $0x78] sm:$0xff]  ;;  %s1110_s26 = scalar_lea.vmem %s1109_s29, 512  ;;  %p1111_p12 = scmp.lt.s32.totalorder %s1591_s6, %s1109_s29 }
  0x62   : > { %v231_v27 = vmul.f32 %v226_v14, %v221_v9  ;;  %v232_v28 = vmul.f32 %v230_v15, %v222_v13  ;;  %v246_v29 = vmul.f32 %v241_v18, %v236_v16  ;;  %v247_v30 = vmul.f32 %v245_v19, %v237_v17  ;;  %v343_v16 = vld [vmem:[#allocation5 + $0x80] sm:$0xff]  ;;  %v344_v17 = vld [vmem:[#allocation5 + $0x88] sm:$0xff]  ;;  %p1107_p8 = pneg %p1106_p6  ;;  %p1112_p13 = scmp.lt.s32.totalorder %s1110_s26, %s1104_s12 }
  0x63   : > { %v261_v32 = vmul.f32 %v256_v22, %v251_v20  ;;  %v262_v33 = vmul.f32 %v260_v23, %v252_v21  ;;  %v276_v34 = vmul.f32 %v271_v25, %v266_v24  ;;  %v277_v35 = vmul.f32 %v275_v26, %v267_v31  ;;  %v358_v24 = vld [vmem:[#allocation5 + $0x90] sm:$0xff]  ;;  %v359_v25 = vld [vmem:[#allocation5 + $0x98] sm:$0xff]  ;;  %v374_v31 = vld [vmem:[#allocation5 + $0xa8] sm:$0xff] }
  0x64   : > { %v248_v38 = vadd.f32 %v246_v29, %v231_v27  ;;  %v249_v39 = vadd.f32 %v247_v30, %v232_v28  ;;  %v286_v40 = vrot.slane %v1389_v7, %v1386_v6  ;;  %v290_v41 = vrot.slane %v1392_v8, %v1386_v6  ;;  %v373_v30 = vld [vmem:[#allocation5 + $0xa0] sm:$0xff]  ;;  %p1113_p0 = por %p1112_p13, %p1111_p12 }
  0x65   : > { %v301_v44 = vrot.slane %v1389_v7, %v1394_v10  ;;  %v305_v45 = vrot.slane %v1392_v8, %v1394_v10  ;;  %v316_v46 = vrot.slane %v1389_v7, %v1396_v11  ;;  %v320_v47 = vrot.slane %v1392_v8, %v1396_v11 }
  0x66   : > { %v263_v48 = vadd.f32 %v261_v32, %v248_v38  ;;  %v264_v49 = vadd.f32 %v262_v33, %v249_v39  ;;  %v291_v50 = vmul.f32 %v286_v40, %v281_v36  ;;  %v292_v51 = vmul.f32 %v290_v41, %v282_v37  ;;  %v388_v38 = vld [vmem:[#allocation5 + $0xb0] sm:$0xff]  ;;  %v389_v39 = vld [vmem:[#allocation5 + $0xb8] sm:$0xff]  ;;  %p1114_p5 = pnand %p1113_p0, %p1107_p8 }
  0x67   : > { %v306_v54 = vmul.f32 %v301_v44, %v296_v42  ;;  %v307_v55 = vmul.f32 %v305_v45, %v297_v43  ;;  %v331_v60 = vrot.slane %v1389_v7, %v1398_v12  ;;  %v335_v61 = vrot.slane %v1392_v8, %v1398_v12 }
  0x68   : > { %v278_v58 = vadd.f32 %v276_v34, %v263_v48  ;;  %v279_v59 = vadd.f32 %v277_v35, %v264_v49  ;;  %v348_v0 = vrot.slane %v1429_v52, %v1378_v2  ;;  %v352_v1 = vrot.slane %v1432_v53, %v1378_v2  ;;  %v403_v48 = vld [vmem:[#allocation5 + $0xc0] sm:$0xff]  ;;  %v404_v49 = vld [vmem:[#allocation5 + $0xc8] sm:$0xff] }
  0x69   : > { %v321_v14 = vmul.f32 %v316_v46, %v311_v56  ;;  %v322_v15 = vmul.f32 %v320_v47, %v312_v57  ;;  %v363_v7 = vrot.slane %v1429_v52, %v1380_v3  ;;  %v367_v8 = vrot.slane %v1432_v53, %v1380_v3  ;;  %v418_v56 = vld [vmem:[#allocation5 + $0xd0] sm:$0xff]  ;;  %v419_v57 = vld [vmem:[#allocation5 + $0xd8] sm:$0xff] }
  0x6a   : > { %v293_v9 = vadd.f32 %v291_v50, %v278_v58  ;;  %v294_v13 = vadd.f32 %v292_v51, %v279_v59  ;;  %v336_v20 = vmul.f32 %v331_v60, %v326_v62  ;;  %v337_v21 = vmul.f32 %v335_v61, %v327_v63 }
  0x6b   : > { %v353_v22 = vmul.f32 %v348_v0, %v343_v16  ;;  %v354_v23 = vmul.f32 %v352_v1, %v344_v17  ;;  %v378_v28 = vrot.slane %v1429_v52, %v1382_v4  ;;  %v382_v29 = vrot.slane %v1432_v53, %v1382_v4  ;;  %v433_v0 = vld [vmem:[#allocation5 + $0xe0] sm:$0xff]  ;;  %v434_v1 = vld [vmem:[#allocation5 + $0xe8] sm:$0xff] }
  0x6c   : > { %v308_v18 = vadd.f32 %v306_v54, %v293_v9  ;;  %v309_v19 = vadd.f32 %v307_v55, %v294_v13  ;;  %v393_v32 = vrot.slane %v1429_v52, %v1384_v5  ;;  %v397_v33 = vrot.slane %v1432_v53, %v1384_v5 }
  0x6d   : > { %v368_v36 = vmul.f32 %v363_v7, %v358_v24  ;;  %v369_v37 = vmul.f32 %v367_v8, %v359_v25  ;;  %v408_v40 = vrot.slane %v1429_v52, %v1386_v6  ;;  %v412_v41 = vrot.slane %v1432_v53, %v1386_v6  ;;  %v465_v24 = vld [vmem:[#allocation5 + $0x100] sm:$0xff]  ;;  %v466_v25 = vld [vmem:[#allocation5 + $0x108] sm:$0xff] }
  0x6e   : > { %v323_v26 = vadd.f32 %v321_v14, %v308_v18  ;;  %v324_v27 = vadd.f32 %v322_v15, %v309_v19  ;;  %v383_v44 = vmul.f32 %v378_v28, %v373_v30  ;;  %v384_v45 = vmul.f32 %v382_v29, %v374_v31  ;;  %v1471_v14 = vld [vmem:[%s1368_s23 + $0x20] sm:$0xff]  ;;  %v1474_v15 = vld [vmem:[%s1368_s23 + $0x28] sm:$0xff] }
  0x6f   : > { %v398_v46 = vmul.f32 %v393_v32, %v388_v38  ;;  %v399_v47 = vmul.f32 %v397_v33, %v389_v39  ;;  %v423_v54 = vrot.slane %v1429_v52, %v1394_v10  ;;  %v427_v55 = vrot.slane %v1432_v53, %v1394_v10  ;;  %v480_v32 = vld [vmem:[#allocation5 + $0x110] sm:$0xff]  ;;  %v481_v33 = vld [vmem:[#allocation5 + $0x118] sm:$0xff] }
  0x70   : > { %v338_v34 = vadd.f32 %v336_v20, %v323_v26  ;;  %v339_v35 = vadd.f32 %v337_v21, %v324_v27  ;;  %v438_v58 = vrot.slane %v1429_v52, %v1396_v11  ;;  %v442_v59 = vrot.slane %v1432_v53, %v1396_v11  ;;  %v448_v20 = vld [vmem:[#allocation5 + $0xf0] sm:$0xff]  ;;  %v449_v21 = vld [vmem:[#allocation5 + $0xf8] sm:$0xff] }
  0x71   : > { %v413_v62 = vmul.f32 %v408_v40, %v403_v48  ;;  %v414_v63 = vmul.f32 %v412_v41, %v404_v49  ;;  %v453_v9 = vrot.slane %v1429_v52, %v1398_v12  ;;  %v457_v13 = vrot.slane %v1432_v53, %v1398_v12  ;;  %v510_v48 = vld [vmem:[#allocation5 + $0x130] sm:$0xff]  ;;  %v511_v49 = vld [vmem:[#allocation5 + $0x138] sm:$0xff] }
  0x72   : > { %v355_v42 = vadd.f32 %v353_v22, %v338_v34  ;;  %v356_v43 = vadd.f32 %v354_v23, %v339_v35  ;;  %v428_v7 = vmul.f32 %v423_v54, %v418_v56  ;;  %v429_v8 = vmul.f32 %v427_v55, %v419_v57 }
  0x73   : > { %v443_v18 = vmul.f32 %v438_v58, %v433_v0  ;;  %v444_v19 = vmul.f32 %v442_v59, %v434_v1  ;;  %v470_v52 = vrot.slane %v1471_v14, %v1378_v2  ;;  %v474_v53 = vrot.slane %v1474_v15, %v1378_v2  ;;  %v525_v58 = vld [vmem:[#allocation5 + $0x140] sm:$0xff]  ;;  %v526_v59 = vld [vmem:[#allocation5 + $0x148] sm:$0xff] }
  0x74   : > { %v370_v50 = vadd.f32 %v368_v36, %v355_v42  ;;  %v371_v51 = vadd.f32 %v369_v37, %v356_v43  ;;  %v485_v26 = vrot.slane %v1471_v14, %v1380_v3  ;;  %v489_v27 = vrot.slane %v1474_v15, %v1380_v3  ;;  %v495_v42 = vld [vmem:[#allocation5 + $0x120] sm:$0xff]  ;;  %v496_v43 = vld [vmem:[#allocation5 + $0x128] sm:$0xff] }
  0x75   : > { %v458_v30 = vmul.f32 %v453_v9, %v448_v20  ;;  %v459_v31 = vmul.f32 %v457_v13, %v449_v21  ;;  %v500_v34 = vrot.slane %v1471_v14, %v1382_v4  ;;  %v504_v35 = vrot.slane %v1474_v15, %v1382_v4  ;;  %v1505_v20 = vld [vmem:[%s1368_s23 + $0x30] sm:$0xff]  ;;  %v1508_v21 = vld [vmem:[%s1368_s23 + $0x38] sm:$0xff] }
  0x76   : > { %v385_v60 = vadd.f32 %v383_v44, %v370_v50  ;;  %v386_v61 = vadd.f32 %v384_v45, %v371_v51  ;;  %v475_v38 = vmul.f32 %v470_v52, %v465_v24  ;;  %v476_v39 = vmul.f32 %v474_v53, %v466_v25 }
  0x77   : > { %v490_v40 = vmul.f32 %v485_v26, %v480_v32  ;;  %v491_v41 = vmul.f32 %v489_v27, %v481_v33  ;;  %v530_v50 = vrot.slane %v1471_v14, %v1386_v6  ;;  %v534_v51 = vrot.slane %v1474_v15, %v1386_v6 }
  0x78   : > { %v400_v16 = vadd.f32 %v398_v46, %v385_v60  ;;  %v401_v17 = vadd.f32 %v399_v47, %v386_v61  ;;  %v515_v46 = vrot.slane %v1471_v14, %v1384_v5  ;;  %v519_v47 = vrot.slane %v1474_v15, %v1384_v5 }
  0x79   : > { %v505_v56 = vmul.f32 %v500_v34, %v495_v42  ;;  %v506_v57 = vmul.f32 %v504_v35, %v496_v43  ;;  %v545_v60 = vrot.slane %v1471_v14, %v1394_v10  ;;  %v549_v61 = vrot.slane %v1474_v15, %v1394_v10  ;;  %v602_v42 = vld [vmem:[#allocation5 + $0x190] sm:$0xff]  ;;  %v603_v43 = vld [vmem:[#allocation5 + $0x198] sm:$0xff] }
  0x7a   : > { %v415_v22 = vadd.f32 %v413_v62, %v400_v16  ;;  %v416_v23 = vadd.f32 %v414_v63, %v401_v17  ;;  %v520_v0 = vmul.f32 %v515_v46, %v510_v48  ;;  %v521_v1 = vmul.f32 %v519_v47, %v511_v49  ;;  %v540_v16 = vld [vmem:[#allocation5 + $0x150] sm:$0xff]  ;;  %v541_v17 = vld [vmem:[#allocation5 + $0x158] sm:$0xff] }
  0x7b   : > { %v535_v9 = vmul.f32 %v530_v50, %v525_v58  ;;  %v536_v13 = vmul.f32 %v534_v51, %v526_v59  ;;  %v575_v52 = vrot.slane %v1471_v14, %v1398_v12  ;;  %v579_v53 = vrot.slane %v1474_v15, %v1398_v12  ;;  %v617_v50 = vld [vmem:[#allocation5 + $0x1a0] sm:$0xff]  ;;  %v618_v51 = vld [vmem:[#allocation5 + $0x1a8] sm:$0xff] }
  0x7c   : > { %v430_v28 = vadd.f32 %v428_v7, %v415_v22  ;;  %v431_v29 = vadd.f32 %v429_v8, %v416_v23  ;;  %v555_v22 = vld [vmem:[#allocation5 + $0x160] sm:$0xff]  ;;  %v556_v23 = vld [vmem:[#allocation5 + $0x168] sm:$0xff]  ;;  %v550_v26 = vmul.f32 %v545_v60, %v540_v16  ;;  %v551_v27 = vmul.f32 %v549_v61, %v541_v17 }
  0x7d   : > { %v647_v16 = vld [vmem:[#allocation5 + $0x1c0] sm:$0xff]  ;;  %v648_v17 = vld [vmem:[#allocation5 + $0x1c8] sm:$0xff] }
  0x7e   : > { %v445_v36 = vadd.f32 %v443_v18, %v430_v28  ;;  %v446_v37 = vadd.f32 %v444_v19, %v431_v29  ;;  %v560_v18 = vrot.slane %v1471_v14, %v1396_v11  ;;  %v564_v19 = vrot.slane %v1474_v15, %v1396_v11  ;;  %v570_v28 = vld [vmem:[#allocation5 + $0x170] sm:$0xff]  ;;  %v571_v29 = vld [vmem:[#allocation5 + $0x178] sm:$0xff]  ;;  %v588_v15 = vld [vmem:[#allocation5 + $0x188] sm:$0xff] }
  0x7f   : > { %v580_v14 = vmul.f32 %v575_v52, %v570_v28  ;;  %v662_v52 = vld [vmem:[#allocation5 + $0x1d0] sm:$0xff] }
  0x80   : > { %v460_v44 = vadd.f32 %v458_v30, %v445_v36  ;;  %v461_v45 = vadd.f32 %v459_v31, %v446_v37  ;;  %v592_v30 = vrot.slane %v1505_v20, %v1378_v2  ;;  %v596_v31 = vrot.slane %v1508_v21, %v1378_v2  ;;  %v587_v37 = vld [vmem:[#allocation5 + $0x180] sm:$0xff] }
  0x81   : > { %v565_v34 = vmul.f32 %v560_v18, %v555_v22  ;;  %v566_v35 = vmul.f32 %v564_v19, %v556_v23  ;;  %v581_v36 = vmul.f32 %v579_v53, %v571_v29  ;;  %v663_v53 = vld [vmem:[#allocation5 + $0x1d8] sm:$0xff] }
  0x82   : > { %v477_v54 = vadd.f32 %v475_v38, %v460_v44  ;;  %v478_v55 = vadd.f32 %v476_v39, %v461_v45  ;;  %v622_v44 = vrot.slane %v1505_v20, %v1382_v4  ;;  %v626_v45 = vrot.slane %v1508_v21, %v1382_v4 }
  0x83   : > { %v597_v48 = vmul.f32 %v592_v30, %v587_v37  ;;  %v598_v49 = vmul.f32 %v596_v31, %v588_v15  ;;  %v1543_v30 = vld [vmem:[%s1368_s23 + $0x40] sm:$0xff]  ;;  %v1546_v31 = vld [vmem:[%s1368_s23 + $0x48] sm:$0xff]  ;;  %v697_v37 = vrot.slane %v1505_v20, %v1398_v12  ;;  %v701_v15 = vrot.slane %v1508_v21, %v1398_v12 }
  0x84   : > { %v492_v62 = vadd.f32 %v490_v40, %v477_v54  ;;  %v493_v63 = vadd.f32 %v491_v41, %v478_v55  ;;  %v607_v40 = vrot.slane %v1505_v20, %v1380_v3  ;;  %v611_v41 = vrot.slane %v1508_v21, %v1380_v3 }
  0x85   : > { %v637_v54 = vrot.slane %v1505_v20, %v1384_v5  ;;  %v641_v55 = vrot.slane %v1508_v21, %v1384_v5  ;;  %v627_v60 = vmul.f32 %v622_v44, %v617_v50  ;;  %v628_v61 = vmul.f32 %v626_v45, %v618_v51 }
  0x86   : > { %v507_v7 = vadd.f32 %v505_v56, %v492_v62  ;;  %v508_v8 = vadd.f32 %v506_v57, %v493_v63  ;;  %v612_v58 = vmul.f32 %v607_v40, %v602_v42  ;;  %v613_v59 = vmul.f32 %v611_v41, %v603_v43  ;;  %v632_v62 = vld [vmem:[#allocation5 + $0x1b0] sm:$0xff]  ;;  %v633_v63 = vld [vmem:[#allocation5 + $0x1b8] sm:$0xff] }
  0x87   : > { %v642_v22 = vmul.f32 %v637_v54, %v632_v62  ;;  %v643_v23 = vmul.f32 %v641_v55, %v633_v63  ;;  %v714_v40 = vrot.slane %v1543_v30, %v1378_v2  ;;  %v718_v41 = vrot.slane %v1546_v31, %v1378_v2  ;;  %v725_v2 = vld [vmem:[#allocation5 + $0x218] sm:$0xff]  ;;  %v740_v62 = vld [vmem:[#allocation5 + $0x228] sm:$0xff] }
  0x88   : > { %v522_v24 = vadd.f32 %v520_v0, %v507_v7  ;;  %v523_v25 = vadd.f32 %v521_v1, %v508_v8  ;;  %v667_v7 = vrot.slane %v1505_v20, %v1394_v10  ;;  %v671_v8 = vrot.slane %v1508_v21, %v1394_v10 }
  0x89   : > { %v763_v63 = vrot.slane %v1546_v31, %v1384_v5 }
  0x8a   : > { %v537_v32 = vadd.f32 %v535_v9, %v522_v24  ;;  %v538_v33 = vadd.f32 %v536_v13, %v523_v25  ;;  %v652_v9 = vrot.slane %v1505_v20, %v1386_v6  ;;  %v656_v13 = vrot.slane %v1508_v21, %v1386_v6 }
  0x8b   : > { %v682_v24 = vrot.slane %v1505_v20, %v1396_v11  ;;  %v686_v25 = vrot.slane %v1508_v21, %v1396_v11  ;;  %v729_v20 = vrot.slane %v1543_v30, %v1380_v3  ;;  %v733_v21 = vrot.slane %v1546_v31, %v1380_v3 }
  0x8c   : > { %v552_v38 = vadd.f32 %v550_v26, %v537_v32  ;;  %v553_v39 = vadd.f32 %v551_v27, %v538_v33  ;;  %v657_v28 = vmul.f32 %v652_v9, %v647_v16  ;;  %v658_v29 = vmul.f32 %v656_v13, %v648_v17  ;;  %v754_v16 = vld [vmem:[#allocation5 + $0x230] sm:$0xff]  ;;  %v755_v17 = vld [vmem:[#allocation5 + $0x238] sm:$0xff] }
  0x8d   : > { %v672_v32 = vmul.f32 %v667_v7, %v662_v52  ;;  %v673_v33 = vmul.f32 %v671_v8, %v663_v53  ;;  %v759_v3 = vrot.slane %v1543_v30, %v1384_v5  ;;  %v735_v13 = vmul.f32 %v733_v21, %v725_v2  ;;  %v770_v52 = vld [vmem:[#allocation5 + $0x248] sm:$0xff] }
  0x8e   : > { %v567_v46 = vadd.f32 %v565_v34, %v552_v38  ;;  %v568_v47 = vadd.f32 %v566_v35, %v553_v39  ;;  %v677_v34 = vld [vmem:[#allocation5 + $0x1e0] sm:$0xff]  ;;  %v678_v35 = vld [vmem:[#allocation5 + $0x1e8] sm:$0xff]  ;;  %v692_v38 = vld [vmem:[#allocation5 + $0x1f0] sm:$0xff]  ;;  %v774_v7 = vrot.slane %v1543_v30, %v1386_v6  ;;  %v765_v53 = vmul.f32 %v763_v63, %v755_v17 }
  0x8f   : > { %v693_v39 = vld [vmem:[#allocation5 + $0x1f8] sm:$0xff]  ;;  %v687_v44 = vmul.f32 %v682_v24, %v677_v34  ;;  %v688_v45 = vmul.f32 %v686_v25, %v678_v35  ;;  %v702_v50 = vmul.f32 %v697_v37, %v692_v38  ;;  %v764_v5 = vmul.f32 %v759_v3, %v754_v16  ;;  %v800_v37 = vld [vmem:[#allocation5 + $0x268] sm:$0xff] }
  0x90   : > { %v582_v56 = vadd.f32 %v580_v14, %v567_v46  ;;  %v583_v57 = vadd.f32 %v581_v36, %v568_v47  ;;  %v709_v46 = vld [vmem:[#allocation5 + $0x200] sm:$0xff]  ;;  %v710_v47 = vld [vmem:[#allocation5 + $0x208] sm:$0xff]  ;;  %v703_v51 = vmul.f32 %v701_v15, %v693_v39  ;;  %v804_v35 = vrot.slane %v1543_v30, %v1396_v11 }
  0x91   : > { %v719_v54 = vmul.f32 %v714_v40, %v709_v46  ;;  %v720_v55 = vmul.f32 %v718_v41, %v710_v47  ;;  %v819_v15 = vrot.slane %v1543_v30, %v1398_v12 }
  0x92   : > { %v599_v0 = vadd.f32 %v597_v48, %v582_v56  ;;  %v600_v1 = vadd.f32 %v598_v49, %v583_v57  ;;  %v724_v56 = vld [vmem:[#allocation5 + $0x210] sm:$0xff] }
  0x93   : > { %v734_v9 = vmul.f32 %v729_v20, %v724_v56 }
  0x94   : > { %v614_v18 = vadd.f32 %v612_v58, %v599_v0  ;;  %v615_v19 = vadd.f32 %v613_v59, %v600_v1  ;;  %v744_v59 = vrot.slane %v1543_v30, %v1382_v4 }
  0x96   : > { %v629_v26 = vadd.f32 %v627_v60, %v614_v18  ;;  %v630_v27 = vadd.f32 %v628_v61, %v615_v19  ;;  %v748_v60 = vrot.slane %v1546_v31, %v1382_v4  ;;  %v739_v61 = vld [vmem:[#allocation5 + $0x220] sm:$0xff]  ;;  %v778_v4 = vrot.slane %v1546_v31, %v1386_v6  ;;  %v784_v6 = vld [vmem:[#allocation5 + $0x250] sm:$0xff] }
  0x97   : > { %v749_v19 = vmul.f32 %v744_v59, %v739_v61 }
  0x98   : > { %v644_v14 = vadd.f32 %v642_v22, %v629_v26  ;;  %v645_v36 = vadd.f32 %v643_v23, %v630_v27  ;;  %v750_v22 = vmul.f32 %v748_v60, %v740_v62  ;;  %v769_v23 = vld [vmem:[#allocation5 + $0x240] sm:$0xff]  ;;  %v789_v26 = vrot.slane %v1543_v30, %v1394_v10 }
  0x99   : > { %v793_v27 = vrot.slane %v1546_v31, %v1394_v10  ;;  %v823_v10 = vrot.slane %v1546_v31, %v1398_v12 }
  0x9a   : > { %v659_v42 = vadd.f32 %v657_v28, %v644_v14  ;;  %v660_v43 = vadd.f32 %v658_v29, %v645_v36  ;;  %v779_v28 = vmul.f32 %v774_v7, %v769_v23  ;;  %v780_v29 = vmul.f32 %v778_v4, %v770_v52  ;;  %v799_v36 = vld [vmem:[#allocation5 + $0x260] sm:$0xff] }
  0x9b   : > { %v808_v14 = vrot.slane %v1546_v31, %v1396_v11  ;;  %v794_v40 = vmul.f32 %v789_v26, %v784_v6  ;;  %v809_v46 = vmul.f32 %v804_v35, %v799_v36 }
  0x9c   : > { %v674_v48 = vadd.f32 %v672_v32, %v659_v42  ;;  %v675_v49 = vadd.f32 %v673_v33, %v660_v43  ;;  %v785_v32 = vld [vmem:[#allocation5 + $0x258] sm:$0xff]  ;;  %v814_v42 = vld [vmem:[#allocation5 + $0x270] sm:$0xff] }
  0x9d   : > { %v795_v41 = vmul.f32 %v793_v27, %v785_v32  ;;  %v815_v43 = vld [vmem:[#allocation5 + $0x278] sm:$0xff]  ;;  %v810_v11 = vmul.f32 %v808_v14, %v800_v37  ;;  %v824_v21 = vmul.f32 %v819_v15, %v814_v42 }
  0x9e   : > { %v689_v57 = vadd.f32 %v687_v44, %v674_v48  ;;  %v690_v58 = vadd.f32 %v688_v45, %v675_v49  ;;  %v825_v30 = vmul.f32 %v823_v10, %v815_v43 }
  0xa0   : > { %v704_v0 = vadd.f32 %v702_v50, %v689_v57  ;;  %v705_v1 = vadd.f32 %v703_v51, %v690_v58 }
  0xa2   : > { %v721_v8 = vadd.f32 %v719_v54, %v704_v0  ;;  %v722_v18 = vadd.f32 %v720_v55, %v705_v1 }
  0xa4   : > { %v736_v24 = vadd.f32 %v734_v9, %v721_v8  ;;  %v737_v25 = vadd.f32 %v735_v13, %v722_v18 }
  0xa6   : > { %v751_v33 = vadd.f32 %v749_v19, %v736_v24  ;;  %v752_v34 = vadd.f32 %v750_v22, %v737_v25 }
  0xa8   : > { %v766_v38 = vadd.f32 %v764_v5, %v751_v33  ;;  %v767_v39 = vadd.f32 %v765_v53, %v752_v34 }
  0xaa   : > { %v781_v44 = vadd.f32 %v779_v28, %v766_v38  ;;  %v782_v45 = vadd.f32 %v780_v29, %v767_v39 }
  0xac   : > { %v796_v47 = vadd.f32 %v794_v40, %v781_v44  ;;  %v797_v20 = vadd.f32 %v795_v41, %v782_v45 }
  0xae   : > { %v811_v12 = vadd.f32 %v809_v46, %v796_v47  ;;  %v812_v31 = vadd.f32 %v810_v11, %v797_v20 }
  0xb0   : > { %v826_v48 = vadd.f32 %v824_v21, %v811_v12  ;;  %v827_v49 = vadd.f32 %v825_v30, %v812_v31 }
  0xb2   : > { %828 = vst [vmem:[%s215_s21] sm:$0xff] %v826_v48  ;;  %829 = vst [vmem:[%s215_s21 + $0x8] sm:$0xff] %v827_v49 }
  0xb3   : > { %1117 = shalt.err (!%p1114_p5)
}
  0xb4   : > { %s1118_s4 = scalar_lea.hbm %s1589_s3, 256  ;;  %s1122_s15 = scalar_lea.hbm %s1640_s2, 512 }
  0xb5   : > { %p1119_p9 = scmp.ne.s32.totalorder %s1589_s3, %s1118_s4  ;;  %p1123_p3 = scmp.lt.u32.totalorder %s1589_s3, %s1640_s2 }
  0xb6   : > { %p1124_p7 = scmp.lt.u32.totalorder %s1122_s15, %s1118_s4  ;;  %p1126_p4 = scmp.lt.u32.totalorder %s1118_s4, %s1589_s3 }
  0xb7   : > { %p1120_p1 = pnand %p1119_p9, %p1307_p10 }
  0xb8   : > { %p1125_p11 = por %p1124_p7, %p1123_p3 }
  0xb9   : > { %p1121_p2 = pneg %p1120_p1 }
  0xba   : > { %p1127_p6 = por %p1126_p4, %p1125_p11 }
  0xbc   : > { %p1128_p8 = pnand %p1127_p6, %p1121_p2 }
  0xbe   : > { %1131 = shalt.err (!%p1128_p8)
}
  0xbf   : > { %977 = dma.vmem_to_hbm [thread:$0]  (%p1307_p10), %s1591_s6, 256, %s1589_s3, %s831_s5  }
  0xc0 PF: > { %s861_s23 = sand.u32 1, %s1170_s9   ;;  %p1657_p12 = scmp.ne.s32.totalorder %s1648_s20, 0 }
  0xc1   : > { %p1658_p13 = scmp.ge.s32.totalorder %s1190_s14, 2  ;;  %s862_s17 = scalar_lea.sflag [#allocation4], %s861_s23 }
  0xc3   : > { %p988_p0 = pnand %p1658_p13, %p1657_p12 }
  0xc5   : > { %1165 = dma.done.wait (!%p988_p0), %s862_s17, 256  }
  0xc6   : > { %1167 = vsyncadd (!%p988_p0), %s862_s17, 4294967040  ;;  %s19_s14 = sadd.s32 1, %s1190_s14   ;;  %s1659_s9 = smov %s1174_s10 }
  0xc7   : > { %p16_p5 = scmp.ge.s32.totalorder %s19_s14, 4   ;;  %s1660_s10 = smov %s1178_s11 }
  0xc8   : > { %s1661_s11 = smov %s1316_s28  ;;  %s1662_s12 = smov %s1186_s13 }
  0xc9   : > { %s1663_s13 = smov %s1665_s25  ;;  %18 = sbr.rel (!%p16_p5) target bundleno = 7 (0x7), region = 117 }
  0xd0   :  { %867 = vsyncpa [#allocation3], 1 }
  0xd1   :  { %869 = vsyncpa [#allocation3 + $0x1], 1 }
  0xd2   :  { %870 = vsyncpa [#allocation6], 1 }
  0xd3   :  { %871 = vsyncpa [#allocation4], 1 }
  0xd4   :  { %873 = vsyncpa [#allocation4 + $0x1], 1 }

</bundles_post_ra>
